<compile_context>
chip_gen: v7x
topology: tpu7x:2x2x1
jax: 0.10.0
libtpu: 0.0.40
codegen_flags: <defaults>
</compile_context>

<pallas_src>
import jax
import jax.numpy as jnp
import numpy as np
from jax import lax
from jax.experimental import pallas as pl
from jax.experimental.pallas import tpu as pltpu

TM = 512  # output superpixel rows per grid step


def _round_up(n, m):
    return ((n + m - 1) // m) * m


def _deconv_superpixel_kernel(p_ref, w_ref, o_ref, sum_ref, ssq_ref):
    """One row-tile grid step.

    p_ref   : (tm, 9*Cin)      bf16 3x3-window patches
    w_ref   : (9*Cin, 4*Cout)  bf16 superpixel weights (4/9-dense, resident)
    o_ref   : (tm, 4*Cout)     bf16 pre-BN activations
    sum_ref : (1, 8, 4*Cout)   f32 per-tile partial channel sums
    ssq_ref : (1, 8, 4*Cout)   f32 per-tile partial channel sum-of-squares
    """
    y = jnp.dot(p_ref[...], w_ref[...], preferred_element_type=jnp.float32)
    o_ref[...] = y.astype(o_ref.dtype)
    s = jnp.sum(y, axis=0, keepdims=True)            # (1, 4*Cout) f32
    q = jnp.sum(y * y, axis=0, keepdims=True)
    # Broadcast into all 8 sublane rows (dense store); only row 0 is consumed.
    sum_ref[...] = jnp.broadcast_to(s, sum_ref.shape)
    ssq_ref[...] = jnp.broadcast_to(q, ssq_ref.shape)


def deconv_forward(x, w, gamma, beta, eps=1e-5, tm=TM):
    """ConvTranspose2d(k=4, s=2, p=1) -> BatchNorm2d(train stats) -> ReLU.

    x: (N, Cin, H, W) f32, w: (Cin, Cout, 4, 4), gamma/beta: (Cout,).
    Returns (N, Cout, 2H, 2W) f32.  The ConvTranspose2d bias is omitted on
    purpose: it cancels exactly under the following train-mode BatchNorm.
    """
    N, Cin, H, W = x.shape
    Cout = w.shape[1]
    Kdim = 9 * Cin                     # 3x3 window taps per superpixel
    Nout = 4 * Cout                    # (ph, pw, co) output columns
    Mp = N * H * W                     # superpixels (= input pixels)

    tm = min(tm, _round_up(Mp, 8))     # shrink tile for tiny problems
    Mp_pad = _round_up(Mp, tm)
    n_tiles = Mp_pad // tm

    # ---- glue: 3x3-window patches, cast to bf16 BEFORE pad/shift/concat so
    # the XLA patch-build intermediate moves in bf16.
    # PyTorch ConvTranspose2d: out[2*oh+ph, 2*ow+pw] += x[oh+dh, ow+dw] *
    # w[ci, co, kh, kw] with kh = ph + 1 - 2*dh, kw = pw + 1 - 2*dw (taps with
    # kh/kw outside [0,4) contribute zero); dh, dw range over {-1, 0, +1}.
    x_nhwc = jnp.transpose(x, (0, 2, 3, 1)).astype(jnp.bfloat16)   # (N,H,W,Cin)
    xp = jnp.pad(x_nhwc, ((0, 0), (1, 1), (1, 1), (0, 0)))

    def shifted(dh, dw):               # x[n, oh+dh, ow+dw, :] with zero pad
        return xp[:, 1 + dh:1 + dh + H, 1 + dw:1 + dw + W, :]

    patches = jnp.concatenate(
        [shifted(dh, dw) for dh in (-1, 0, 1) for dw in (-1, 0, 1)],
        axis=-1).reshape(Mp, Kdim)                                  # bf16
    if Mp_pad != Mp:                   # ragged rows: zero rows add 0 to stats
        patches = jnp.pad(patches, ((0, Mp_pad - Mp), (0, 0)))

    # ---- superpixel weight: rows (dh, dw, ci) -> cols (ph, pw, co).
    zero_blk = jnp.zeros((Cin, Cout), w.dtype)
    w_rows = []
    for dh in (-1, 0, 1):
        for dw in (-1, 0, 1):
            cols = []
            for ph in (0, 1):
                for pw in (0, 1):
                    kh = ph + 1 - 2 * dh
                    kw = pw + 1 - 2 * dw
                    cols.append(w[:, :, kh, kw]
                                if (0 <= kh < 4 and 0 <= kw < 4) else zero_blk)
            w_rows.append(jnp.concatenate(cols, axis=1))            # (Cin, 4*Cout)
    w_sp = jnp.concatenate(w_rows, axis=0).astype(jnp.bfloat16)     # (9*Cin, 4*Cout)

    # ---- VMEM budget: double-buffered streaming patches/out + resident
    # weights/stats; floor 32 MiB (v5e scoped default is only 16 MiB), cap
    # 48 MiB (v7x has 64 MiB physical VMEM per TensorCore).
    step_bytes = (tm * Kdim * 2 + tm * Nout * 2
                  + Kdim * Nout * 2 + 2 * 8 * Nout * 4)
    vmem_limit = int(max(32 << 20, min(4 * step_bytes + (4 << 20), 48 << 20)))

    # ---- Pallas: superpixel matmul + per-tile BN partial stats in one pass.
    conv_out, sums, ssqs = pl.pallas_call(
        _deconv_superpixel_kernel,
        out_shape=(
            jax.ShapeDtypeStruct((Mp_pad, Nout), jnp.bfloat16),
            jax.ShapeDtypeStruct((n_tiles, 8, Nout), jnp.float32),
            jax.ShapeDtypeStruct((n_tiles, 8, Nout), jnp.float32),
        ),
        grid_spec=pltpu.PrefetchScalarGridSpec(
            num_scalar_prefetch=0,
            grid=(n_tiles,),
            in_specs=[
                pl.BlockSpec((tm, Kdim), lambda i: (i, 0)),
                pl.BlockSpec((Kdim, Nout), lambda i: (0, 0)),   # resident
            ],
            out_specs=(
                pl.BlockSpec((tm, Nout), lambda i: (i, 0)),
                pl.BlockSpec((1, 8, Nout), lambda i: (i, 0, 0)),
                pl.BlockSpec((1, 8, Nout), lambda i: (i, 0, 0)),
            ),
        ),
        compiler_params=pltpu.CompilerParams(
            dimension_semantics=("parallel",),
            vmem_limit_bytes=vmem_limit),
    )(patches, w_sp)

    # ---- plain-JAX epilogue (XLA fuses BN + ReLU with the interleave).
    inv_m = 1.0 / (4.0 * Mp)                             # real elems / channel
    csum = sums[:, 0, :].sum(axis=0).reshape(4, Cout).sum(axis=0)   # (Cout,)
    cssq = ssqs[:, 0, :].sum(axis=0).reshape(4, Cout).sum(axis=0)
    mean = csum * inv_m
    var = cssq * inv_m - mean * mean                     # bias-free conv
    scale = gamma.astype(jnp.float32) * lax.rsqrt(var + eps)
    shift = beta.astype(jnp.float32) - mean * scale

    y = conv_out[:Mp].astype(jnp.float32).reshape(Mp, 4, Cout)
    y = jnp.maximum(y * scale + shift, 0.0)
    # (n, oh, ow, ph, pw, co) -> (n, 2*oh+ph, 2*ow+pw, co): Cout stays on the
    # lane dim through the phase interleave (cheap), then a single
    # NHWC -> NCHW transpose to match the PyTorch module's output layout.
    y = y.reshape(N, H, W, 2, 2, Cout).transpose(0, 1, 3, 2, 4, 5)
    y_nhwc = y.reshape(N, 2 * H, 2 * W, Cout)
    return jnp.transpose(y_nhwc, (0, 3, 1, 2))


def _reference(x, w, b, gamma, beta, eps=1e-5):
    """Pure-JAX reference matching PyTorch Deconv.forward (train mode)."""
    Cout = w.shape[1]
    rhs = jnp.flip(w, axis=(-2, -1)).transpose(1, 0, 2, 3)       # (Cout,Cin,4,4)
    conv = lax.conv_general_dilated(
        x, rhs, window_strides=(1, 1), padding=((2, 2), (2, 2)),
        lhs_dilation=(2, 2), dimension_numbers=("NCHW", "OIHW", "NCHW"))
    conv = conv + b.reshape(1, Cout, 1, 1)
    mean = conv.mean(axis=(0, 2, 3), keepdims=True)
    var = ((conv - mean) ** 2).mean(axis=(0, 2, 3), keepdims=True)
    y = (conv - mean) / jnp.sqrt(var + eps)
    y = y * gamma.reshape(1, Cout, 1, 1) + beta.reshape(1, Cout, 1, 1)
    return jnp.maximum(y, 0.0)


if __name__ == "__main__":
    # Deconv(in_n=4, out_n=8) on x = (2, 4, 16, 16)  ->  (2, 8, 32, 32)
    N, Cin, Cout, H, W = 2, 4, 8, 16, 16
    key = jax.random.PRNGKey(0)
    kx, kw, kb, kg, kbt = jax.random.split(key, 5)

    x = jax.random.normal(kx, (N, Cin, H, W), dtype=jnp.float32)
    w = jax.random.normal(kw, (Cin, Cout, 4, 4), dtype=jnp.float32) * 0.1
    b = jax.random.normal(kb, (Cout,), dtype=jnp.float32) * 0.1
    gamma = 0.5 + jax.random.uniform(kg, (Cout,), dtype=jnp.float32)
    beta = jax.random.normal(kbt, (Cout,), dtype=jnp.float32) * 0.1

    # The Pallas path feeds the MXU in bf16; quantize x/w onto the bf16 grid
    # so the f32 reference isolates algorithmic correctness from the intended
    # mixed-precision choice (only the bf16 activation store remains inexact).
    x = x.astype(jnp.bfloat16).astype(jnp.float32)
    w = w.astype(jnp.bfloat16).astype(jnp.float32)

    fwd = jax.jit(deconv_forward)
    out = jax.block_until_ready(fwd(x, w, gamma, beta))
    # Reference keeps the ConvTranspose2d bias; it cancels under train-mode BN,
    # so the bias-free Pallas path must still match.
    ref = jax.block_until_ready(_reference(x, w, b, gamma, beta))

    assert out.shape == (N, Cout, 2 * H, 2 * W), out.shape
    # pre-BN activations are stored in bf16 -> ~1e-2 level tolerance.
    np.testing.assert_allclose(np.asarray(out), np.asarray(ref),
                               rtol=2e-2, atol=2e-2)
    print("KERNEL_OK")
</pallas_src>

<mosaic_0001>
module attributes {stable_mosaic.version = 11 : i64} {
  func.func @_deconv_superpixel_kernel(%arg0: i32, %arg1: memref<512x36xbf16, #tpu.memory_space<vmem>>, %arg2: memref<36x32xbf16, #tpu.memory_space<vmem>>, %arg3: memref<512x32xbf16, #tpu.memory_space<vmem>>, %arg4: memref<1x8x32xf32, #tpu.memory_space<vmem>>, %arg5: memref<1x8x32xf32, #tpu.memory_space<vmem>>) attributes {dimension_semantics = [#tpu.dimension_semantics<parallel>], iteration_bounds = array<i64: 1>, scalar_prefetch = 0 : i64, scratch_operands = 0 : i64, tpu.core_type = #tpu.core_type<tc>, window_params = [{transform_indices = @transform_0, window_bounds = array<i64: 512, 36>}, {pipeline_mode = #tpu.pipeline_mode<synchronous>, transform_indices = @transform_1, window_bounds = array<i64: 36, 32>}, {transform_indices = @transform_2, window_bounds = array<i64: 512, 32>}, {transform_indices = @transform_3, window_bounds = array<i64: 1, 8, 32>}, {transform_indices = @transform_4, window_bounds = array<i64: 1, 8, 32>}]} {
    %c0 = arith.constant 0 : index
    %c0_0 = arith.constant 0 : index
    %0 = vector.load %arg1[%c0, %c0_0] : memref<512x36xbf16, #tpu.memory_space<vmem>>, vector<512x36xbf16>
    %c0_1 = arith.constant 0 : index
    %c0_2 = arith.constant 0 : index
    %1 = vector.load %arg2[%c0_1, %c0_2] : memref<36x32xbf16, #tpu.memory_space<vmem>>, vector<36x32xbf16>
    %cst = arith.constant dense<0.000000e+00> : vector<512x32xf32>
    %2 = tpu.matmul %0, %1, %cst {dimension_numbers = #tpu.dot_dimension_numbers<[1], [0], [0], [1], [0, 0, 1, 1], [], []>} : vector<512x36xbf16>, vector<36x32xbf16>, vector<512x32xf32> -> vector<512x32xf32>
    %3 = arith.truncf %2 : vector<512x32xf32> to vector<512x32xbf16>
    %c0_3 = arith.constant 0 : index
    %c0_4 = arith.constant 0 : index
    %4 = vector.load %arg3[%c0_3, %c0_4] : memref<512x32xbf16, #tpu.memory_space<vmem>>, vector<512x32xbf16>
    tpu.vector_store %arg3[%c0_3, %c0_4], %3 {strides = array<i32>} : memref<512x32xbf16, #tpu.memory_space<vmem>>, vector<512x32xbf16>,
    %cst_5 = arith.constant dense<0.000000e+00> : vector<32xf32>
    %5 = vector.multi_reduction <add>, %2, %cst_5 [0] : vector<512x32xf32> to vector<32xf32>
    %6 = vector.shape_cast %5 : vector<32xf32> to vector<1x32xf32>
    %7 = arith.mulf %2, %2 : vector<512x32xf32>
    %cst_6 = arith.constant dense<0.000000e+00> : vector<32xf32>
    %8 = vector.multi_reduction <add>, %7, %cst_6 [0] : vector<512x32xf32> to vector<32xf32>
    %9 = vector.shape_cast %8 : vector<32xf32> to vector<1x32xf32>
    %10 = vector.shape_cast %6 : vector<1x32xf32> to vector<1x1x32xf32>
    %11 = vector.broadcast %10 : vector<1x1x32xf32> to vector<1x8x32xf32>
    %c0_7 = arith.constant 0 : index
    %c0_8 = arith.constant 0 : index
    %c0_9 = arith.constant 0 : index
    %12 = vector.load %arg4[%c0_7, %c0_8, %c0_9] : memref<1x8x32xf32, #tpu.memory_space<vmem>>, vector<1x8x32xf32>
    tpu.vector_store %arg4[%c0_7, %c0_8, %c0_9], %11 {strides = array<i32>} : memref<1x8x32xf32, #tpu.memory_space<vmem>>, vector<1x8x32xf32>,
    %13 = vector.shape_cast %9 : vector<1x32xf32> to vector<1x1x32xf32>
    %14 = vector.broadcast %13 : vector<1x1x32xf32> to vector<1x8x32xf32>
    %c0_10 = arith.constant 0 : index
    %c0_11 = arith.constant 0 : index
    %c0_12 = arith.constant 0 : index
    %15 = vector.load %arg5[%c0_10, %c0_11, %c0_12] : memref<1x8x32xf32, #tpu.memory_space<vmem>>, vector<1x8x32xf32>
    tpu.vector_store %arg5[%c0_10, %c0_11, %c0_12], %14 {strides = array<i32>} : memref<1x8x32xf32, #tpu.memory_space<vmem>>, vector<1x8x32xf32>,
    return
  }
  func.func @transform_0(%arg0: i32) -> (i32, i32) {
    %c0_i32 = arith.constant 0 : i32
    %c0_i32_0 = arith.constant 0 : i32
    return %arg0, %c0_i32 : i32, i32
  }
  func.func @transform_1(%arg0: i32) -> (i32, i32) {
    %c0_i32 = arith.constant 0 : i32
    %c0_i32_0 = arith.constant 0 : i32
    %c0_i32_1 = arith.constant 0 : i32
    return %c0_i32, %c0_i32_0 : i32, i32
  }
  func.func @transform_2(%arg0: i32) -> (i32, i32) {
    %c0_i32 = arith.constant 0 : i32
    %c0_i32_0 = arith.constant 0 : i32
    return %arg0, %c0_i32 : i32, i32
  }
  func.func @transform_3(%arg0: i32) -> (i32, i32, i32) {
    %c0_i32 = arith.constant 0 : i32
    %c0_i32_0 = arith.constant 0 : i32
    %c0_i32_1 = arith.constant 0 : i32
    return %arg0, %c0_i32, %c0_i32_0 : i32, i32, i32
  }
  func.func @transform_4(%arg0: i32) -> (i32, i32, i32) {
    %c0_i32 = arith.constant 0 : i32
    %c0_i32_0 = arith.constant 0 : i32
    %c0_i32_1 = arith.constant 0 : i32
    return %arg0, %c0_i32, %c0_i32_0 : i32, i32, i32
  }
}

</mosaic_0001>

<bundles_post_ra>
// kernel: deconv_forward.1
= control target key start
LH: loop header
LB: loop body
LE: loop exit
PB: predicated region body
PF: predicated region fallthrough
CT: control target
= control target key end

     0   :  { %vm259_vm0 = vcmask 293888   ;;  %vm356_vm1 = vcmask 1041408   ;;  %vm905_vm2 = vcmask 257024   ;;  %vm970_vm3 = vcmask 261120   ;;  %s2436_s1 = inlined_call_operand.vmem [shape: bf16[36,32], index: 1, kind: input, shape index: {}]   ;;  %s2437_s0 = inlined_call_operand.vmem [shape: bf16[512,36], index: 0, kind: input, shape index: {}]   ;;  %s2438_s2 = inlined_call_operand.vmem [shape: bf16[512,32], index: 2, kind: output, shape index: {0}]   ;;  %s2439_s3 = inlined_call_operand.vmem [shape: f32[1,8,32], index: 3, kind: output, shape index: {1}]   ;;  %s2440_s4 = inlined_call_operand.vmem [shape: f32[1,8,32], index: 4, kind: output, shape index: {2}]  }
   0x1   :  { %v1623_v0 = vld [vmem:[%s2436_s1] sm:$0xff]   ;;  %v1624_v1 = vld [vmem:[%s2436_s1 + $0x8] sm:$0xff]   ;;  %v1625_v2 = vld [vmem:[%s2436_s1 + $0x10] ss:$0 sps:$4 sm:$0x33]  }
   0x2   :  { %1545 = vmatprep.subr.bf16.mxu0 %v1623_v0  ;;  %v1626_v3 = vld [vmem:[%s2437_s0] sm:$0xff]   ;;  %1615 = vmatprep.subr.bf16.mxu1 %v1623_v0  ;;  %v358_v4 = vsel %vm356_vm1, %v1625_v2, 0  ;;  %v1627_v5 = vld [vmem:[%s2437_s0 + $0x8] sm:$0xff]   ;;  %v1628_v6 = vld [vmem:[%s2437_s0 + $0x10] sm:$0xff]  }
   0x3   :  { %1546 = vmatpush3.bf16.msra.mxu0 %v1623_v0  ;;  %1618 = vmatpush3.bf16.msra.mxu1 %v1623_v0  ;;  %v1629_v7 = vld [vmem:[%s2437_s0 + $0x18] sm:$0xff]   ;;  %v1630_v8 = vld [vmem:[%s2437_s0 + $0x20] sm:$0xff]   ;;  %v1643_v10 = vld [vmem:[%s2437_s0 + $0x88] sm:$0xff]  }
   0x4   :  { %1547 = vmatprep.subr.bf16.mxu0 %v1624_v1  ;;  %1551 = vmatprep.mubr.msk.bf16.mxu0 %vm259_vm0, %v1626_v3  ;;  %v1642_v9 = vld [vmem:[%s2437_s0 + $0x80] sm:$0xff]   ;;  %v1644_v11 = vld [vmem:[%s2437_s0 + $0x90] sm:$0xff]   ;;  %v1631_v12 = vld [vmem:[%s2437_s0 + $0x28] sm:$0xff]  }
   0x5   :  { %1616 = vmatprep.subr.bf16.mxu1 %v1624_v1  ;;  %1583 = vmatprep.mubr.msk.bf16.mxu1 %vm259_vm0, %v1642_v9  ;;  %v1632_v13 = vld [vmem:[%s2437_s0 + $0x30] sm:$0xff]   ;;  %v1645_v14 = vld [vmem:[%s2437_s0 + $0x98] sm:$0xff]   ;;  %v1646_v15 = vld [vmem:[%s2437_s0 + $0xa0] sm:$0xff]  }
   0x6   :  { %v1633_v16 = vld [vmem:[%s2437_s0 + $0x38] sm:$0xff]   ;;  %v1647_v17 = vld [vmem:[%s2437_s0 + $0xa8] sm:$0xff]   ;;  %v1634_v18 = vld [vmem:[%s2437_s0 + $0x40] sm:$0xff]  }
   0x7   :  { %1548 = vmatpush3.bf16.msra.mxu0 %v1624_v1  ;;  %1619 = vmatpush3.bf16.msra.mxu1 %v1624_v1  ;;  %v1648_v19 = vld [vmem:[%s2437_s0 + $0xb0] sm:$0xff]   ;;  %v1635_v20 = vld [vmem:[%s2437_s0 + $0x48] sm:$0xff]   ;;  %v1649_v21 = vld [vmem:[%s2437_s0 + $0xb8] sm:$0xff]  }
   0x8   :  { %1621 = vmatprep.subr.msk.bf16.mxu0 %vm356_vm1, %v1625_v2  ;;  %1622 = vmatprep.subr.msk.bf16.mxu1 %vm356_vm1, %v1625_v2  ;;  %v1636_v22 = vld [vmem:[%s2437_s0 + $0x50] sm:$0xff]   ;;  %v1650_v23 = vld [vmem:[%s2437_s0 + $0xc0] sm:$0xff]   ;;  %v1637_v24 = vld [vmem:[%s2437_s0 + $0x58] sm:$0xff]  }
   0x9   :  { %v1651_v25 = vld [vmem:[%s2437_s0 + $0xc8] sm:$0xff]   ;;  %v1638_v26 = vld [vmem:[%s2437_s0 + $0x60] sm:$0xff]   ;;  %v1652_v27 = vld [vmem:[%s2437_s0 + $0xd0] sm:$0xff]  }
   0xa   :  { %v1639_v28 = vld [vmem:[%s2437_s0 + $0x68] sm:$0xff]   ;;  %v1653_v29 = vld [vmem:[%s2437_s0 + $0xd8] sm:$0xff]   ;;  %v1640_v30 = vld [vmem:[%s2437_s0 + $0x70] sm:$0xff]  }
   0xb   :  { %1550 = vmatpush3.bf16.msra.mxu0 %v358_v4  ;;  %1620 = vmatpush3.bf16.msra.mxu1 %v358_v4  ;;  %v1654_v31 = vld [vmem:[%s2437_s0 + $0xe0] sm:$0xff]   ;;  %v1641_v32 = vld [vmem:[%s2437_s0 + $0x78] sm:$0xff]   ;;  %v1655_v33 = vld [vmem:[%s2437_s0 + $0xe8] sm:$0xff]  }
   0xc   :  { %v1656_v34 = vld [vmem:[%s2437_s0 + $0xf0] sm:$0xff]   ;;  %v1657_v35 = vld [vmem:[%s2437_s0 + $0xf8] sm:$0xff]  }
   0xe   :  { %1552 = vmatmul.mubr.msk.bf16.vlgmr.msra.gmra.mrb[0].mxu0 %vm259_vm0, %v1627_v5  ;;  %1584 = vmatmul.mubr.msk.bf16.vlgmr.msra.gmra.mrb[0].mxu1 %vm259_vm0, %v1643_v10 }
   0xf   :  { %1555 = vmatprep.mubr.msk.bf16.mxu0 %vm259_vm0, %v1628_v6  ;;  %1587 = vmatprep.mubr.msk.bf16.mxu1 %vm259_vm0, %v1644_v11 }
  0x16   :  { %1556 = vmatmul.mubr.msk.bf16.gmra.mrb[4].mxu0 %vm259_vm0, %v1629_v7  ;;  %1588 = vmatmul.mubr.msk.bf16.gmra.mrb[4].mxu1 %vm259_vm0, %v1645_v14 }
  0x17   :  { %1559 = vmatprep.mubr.msk.bf16.mxu0 %vm259_vm0, %v1630_v8  ;;  %1591 = vmatprep.mubr.msk.bf16.mxu1 %vm259_vm0, %v1646_v15 }
  0x1e   :  { %1560 = vmatmul.mubr.msk.bf16.gmra.mrb[8].mxu0 %vm259_vm0, %v1631_v12  ;;  %1592 = vmatmul.mubr.msk.bf16.gmra.mrb[8].mxu1 %vm259_vm0, %v1647_v17 }
  0x1f   :  { %1563 = vmatprep.mubr.msk.bf16.mxu0 %vm259_vm0, %v1632_v13  ;;  %1595 = vmatprep.mubr.msk.bf16.mxu1 %vm259_vm0, %v1648_v19 }
  0x26   :  { %1564 = vmatmul.mubr.msk.bf16.gmra.mrb[12].mxu0 %vm259_vm0, %v1633_v16  ;;  %1596 = vmatmul.mubr.msk.bf16.gmra.mrb[12].mxu1 %vm259_vm0, %v1649_v21 }
  0x27   :  { %1567 = vmatprep.mubr.msk.bf16.mxu0 %vm259_vm0, %v1634_v18  ;;  %1599 = vmatprep.mubr.msk.bf16.mxu1 %vm259_vm0, %v1650_v23 }
  0x2e   :  { %1568 = vmatmul.mubr.msk.bf16.gmra.mrb[16].mxu0 %vm259_vm0, %v1635_v20  ;;  %1600 = vmatmul.mubr.msk.bf16.gmra.mrb[16].mxu1 %vm259_vm0, %v1651_v25 }
  0x2f   :  { %1571 = vmatprep.mubr.msk.bf16.mxu0 %vm259_vm0, %v1636_v22  ;;  %1603 = vmatprep.mubr.msk.bf16.mxu1 %vm259_vm0, %v1652_v27 }
  0x36   :  { %1572 = vmatmul.mubr.msk.bf16.gmra.mrb[20].mxu0 %vm259_vm0, %v1637_v24  ;;  %1604 = vmatmul.mubr.msk.bf16.gmra.mrb[20].mxu1 %vm259_vm0, %v1653_v29 }
  0x37   :  { %1575 = vmatprep.mubr.msk.bf16.mxu0 %vm259_vm0, %v1638_v26  ;;  %1607 = vmatprep.mubr.msk.bf16.mxu1 %vm259_vm0, %v1654_v31 }
  0x3e   :  { %1576 = vmatmul.mubr.msk.bf16.gmra.mrb[24].mxu0 %vm259_vm0, %v1639_v28  ;;  %1608 = vmatmul.mubr.msk.bf16.gmra.mrb[24].mxu1 %vm259_vm0, %v1655_v33 }
  0x3f   :  { %1579 = vmatprep.mubr.msk.bf16.mxu0 %vm259_vm0, %v1640_v30  ;;  %1611 = vmatprep.mubr.msk.bf16.mxu1 %vm259_vm0, %v1656_v34 }
  0x46   :  { %1580 = vmatmul.mubr.msk.bf16.gmra.mrb[28].mxu0 %vm259_vm0, %v1641_v32  ;;  %1612 = vmatmul.mubr.msk.bf16.gmra.mrb[28].mxu1 %vm259_vm0, %v1657_v35 }
  0xe1   :  { %v1553_v36 = vpop.f32.mrb[0].mxu0  ;;  %v1842_v58 = vpop.f32.mrb[0].mxu1 }
  0xe2   :  { %v1448_v37 = vpack.c.bf16 %v1553_v36, %v1553_v36  ;;  %v394_v38 = vpop.f32.mrb[1].mxu0  ;;  %v1106_v42 = vmul.f32 %v1553_v36, %v1553_v36  ;;  %v974_v51 = vsel %vm970_vm3, %v1553_v36, 0.0  ;;  %v1846_v0 = vpop.f32.mrb[1].mxu1  ;;  %v1480_v18 = vpack.c.bf16 %v1842_v58, %v1842_v58 }
  0xe3   :  { %v1446_v39 = vpack.c.bf16 %v394_v38, %v394_v38  ;;  %v1104_v40 = vmul.f32 %v394_v38, %v394_v38  ;;  %v1554_v41 = vpop.f32.mrb[2].mxu0  ;;  %v971_v45 = vsel %vm970_vm3, %v394_v38, 0.0  ;;  %v1849_v6 = vpop.f32.mrb[2].mxu1  ;;  %v1478_v23 = vpack.c.bf16 %v1846_v0, %v1846_v0 }
  0xe4   :  { %908 = vst.msk [vmem:[%s2438_s2 + $0x8] sm:$0xf] %vm905_vm2, %v1448_v37  ;;  %v1449_v43 = vpack.c.bf16 %v1554_v41, %v1554_v41  ;;  %v397_v44 = vpop.f32.mrb[3].mxu0  ;;  %v1107_v49 = vmul.f32 %v1554_v41, %v1554_v41  ;;  %v1171_v56 = vsel %vm970_vm3, %v1106_v42, 0.0  ;;  %v976_v59 = vsel %vm970_vm3, %v1554_v41, 0.0  ;;  %v1855_v10 = vpop.f32.mrb[3].mxu1 }
  0xe5   :  { %906 = vst.msk [vmem:[%s2438_s2] sm:$0xf] %vm905_vm2, %v1446_v39  ;;  %v1447_v46 = vpack.c.bf16 %v397_v44, %v397_v44  ;;  %v972_v47 = vsel %vm970_vm3, %v397_v44, 0.0  ;;  %v1105_v48 = vmul.f32 %v397_v44, %v397_v44  ;;  %v1168_v52 = vsel %vm970_vm3, %v1104_v40, 0.0  ;;  %940 = vst.msk [vmem:[%s2438_s2 + $0x88] sm:$0xf] %vm905_vm2, %v1480_v18 }
  0xe6   :  { %909 = vst.msk [vmem:[%s2438_s2 + $0xc] sm:$0xf] %vm905_vm2, %v1449_v43  ;;  %v973_v50 = vadd.f32 %v972_v47, %v971_v45  ;;  %v1173_v60 = vsel %vm970_vm3, %v1107_v49, 0.0  ;;  %v1481_v27 = vpack.c.bf16 %v1849_v6, %v1849_v6  ;;  %938 = vst.msk [vmem:[%s2438_s2 + $0x80] sm:$0xf] %vm905_vm2, %v1478_v23 }
  0xe7   :  { %907 = vst.msk [vmem:[%s2438_s2 + $0x4] sm:$0xf] %vm905_vm2, %v1447_v46  ;;  %v1169_v53 = vsel %vm970_vm3, %v1105_v48, 0.0 }
  0xe8   :  { %v975_v54 = vadd.f32 %v974_v51, %v973_v50  ;;  %v1170_v55 = vadd.f32 %v1169_v53, %v1168_v52  ;;  %941 = vst.msk [vmem:[%s2438_s2 + $0x8c] sm:$0xf] %vm905_vm2, %v1481_v27 }
  0xe9   :  { %v1557_v57 = vpop.f32.mrb[4].mxu0  ;;  %v1883_v28 = vpop.f32.mrb[4].mxu1 }
  0xea   :  { %v1172_v61 = vadd.f32 %v1171_v56, %v1170_v55  ;;  %v1452_v62 = vpack.c.bf16 %v1557_v57, %v1557_v57  ;;  %v410_v63 = vpop.f32.mrb[5].mxu0  ;;  %v977_v2 = vadd.f32 %v976_v59, %v975_v54  ;;  %v1110_v11 = vmul.f32 %v1557_v57, %v1557_v57  ;;  %v1891_v33 = vpop.f32.mrb[5].mxu1 }
  0xeb   :  { %v1450_v1 = vpack.c.bf16 %v410_v63, %v410_v63  ;;  %v978_v3 = vsel %vm970_vm3, %v410_v63, 0.0  ;;  %v1108_v4 = vmul.f32 %v410_v63, %v410_v63  ;;  %v1558_v5 = vpop.f32.mrb[6].mxu0  ;;  %v982_v20 = vsel %vm970_vm3, %v1557_v57, 0.0  ;;  %v1898_v39 = vpop.f32.mrb[6].mxu1 }
  0xec   :  { %912 = vst.msk [vmem:[%s2438_s2 + $0x18] sm:$0xf] %vm905_vm2, %v1452_v62  ;;  %v1174_v7 = vadd.f32 %v1173_v60, %v1172_v61  ;;  %v1453_v8 = vpack.c.bf16 %v1558_v5, %v1558_v5  ;;  %v413_v9 = vpop.f32.mrb[7].mxu0  ;;  %v979_v12 = vadd.f32 %v978_v3, %v977_v2  ;;  %v1111_v21 = vmul.f32 %v1558_v5, %v1558_v5  ;;  %v1905_v44 = vpop.f32.mrb[7].mxu1 }
  0xed   :  { %910 = vst.msk [vmem:[%s2438_s2 + $0x10] sm:$0xf] %vm905_vm2, %v1450_v1  ;;  %v1175_v13 = vsel %vm970_vm3, %v1108_v4, 0.0  ;;  %v1451_v14 = vpack.c.bf16 %v413_v9, %v413_v9  ;;  %v980_v16 = vsel %vm970_vm3, %v413_v9, 0.0  ;;  %v1109_v17 = vmul.f32 %v413_v9, %v413_v9 }
  0xee   :  { %v1176_v15 = vadd.f32 %v1175_v13, %v1174_v7  ;;  %913 = vst.msk [vmem:[%s2438_s2 + $0x1c] sm:$0xf] %vm905_vm2, %v1453_v8  ;;  %v981_v19 = vadd.f32 %v980_v16, %v979_v12  ;;  %v1179_v29 = vsel %vm970_vm3, %v1110_v11, 0.0  ;;  %v984_v30 = vsel %vm970_vm3, %v1558_v5, 0.0 }
  0xef   :  { %911 = vst.msk [vmem:[%s2438_s2 + $0x14] sm:$0xf] %vm905_vm2, %v1451_v14  ;;  %v1177_v22 = vsel %vm970_vm3, %v1109_v17, 0.0  ;;  %v1181_v40 = vsel %vm970_vm3, %v1111_v21, 0.0  ;;  %v1479_v57 = vpack.c.bf16 %v1855_v10, %v1855_v10  ;;  %v1484_v62 = vpack.c.bf16 %v1883_v28, %v1883_v28 }
  0xf0   :  { %v983_v24 = vadd.f32 %v982_v20, %v981_v19  ;;  %v1178_v25 = vadd.f32 %v1177_v22, %v1176_v15 }
  0xf1   :  { %v1561_v26 = vpop.f32.mrb[8].mxu0  ;;  %v1927_v63 = vpop.f32.mrb[8].mxu1  ;;  %939 = vst.msk [vmem:[%s2438_s2 + $0x84] sm:$0xf] %vm905_vm2, %v1479_v57  ;;  %944 = vst.msk [vmem:[%s2438_s2 + $0x98] sm:$0xf] %vm905_vm2, %v1484_v62 }
  0xf2   :  { %v1456_v31 = vpack.c.bf16 %v1561_v26, %v1561_v26  ;;  %v426_v32 = vpop.f32.mrb[9].mxu0  ;;  %v1180_v34 = vadd.f32 %v1179_v29, %v1178_v25  ;;  %v985_v36 = vadd.f32 %v984_v30, %v983_v24  ;;  %v1114_v48 = vmul.f32 %v1561_v26, %v1561_v26  ;;  %v1935_v5 = vpop.f32.mrb[9].mxu1 }
  0xf3   :  { %v1454_v35 = vpack.c.bf16 %v426_v32, %v426_v32  ;;  %v986_v37 = vsel %vm970_vm3, %v426_v32, 0.0  ;;  %v1562_v38 = vpop.f32.mrb[10].mxu0  ;;  %v1112_v41 = vmul.f32 %v426_v32, %v426_v32  ;;  %v990_v54 = vsel %vm970_vm3, %v1561_v26, 0.0  ;;  %v1942_v13 = vpop.f32.mrb[10].mxu1 }
  0xf4   :  { %916 = vst.msk [vmem:[%s2438_s2 + $0x28] sm:$0xf] %vm905_vm2, %v1456_v31  ;;  %v1457_v42 = vpack.c.bf16 %v1562_v38, %v1562_v38  ;;  %v429_v43 = vpop.f32.mrb[11].mxu0  ;;  %v987_v45 = vadd.f32 %v986_v37, %v985_v36  ;;  %v1182_v46 = vadd.f32 %v1181_v40, %v1180_v34  ;;  %v1115_v55 = vmul.f32 %v1562_v38, %v1562_v38  ;;  %v1949_v18 = vpop.f32.mrb[11].mxu1 }
  0xf5   :  { %914 = vst.msk [vmem:[%s2438_s2 + $0x20] sm:$0xf] %vm905_vm2, %v1454_v35  ;;  %v1455_v47 = vpack.c.bf16 %v429_v43, %v429_v43  ;;  %v1183_v49 = vsel %vm970_vm3, %v1112_v41, 0.0  ;;  %v988_v50 = vsel %vm970_vm3, %v429_v43, 0.0  ;;  %v1113_v51 = vmul.f32 %v429_v43, %v429_v43 }
  0xf6   :  { %917 = vst.msk [vmem:[%s2438_s2 + $0x2c] sm:$0xf] %vm905_vm2, %v1457_v42  ;;  %v1184_v52 = vadd.f32 %v1183_v49, %v1182_v46  ;;  %v989_v53 = vadd.f32 %v988_v50, %v987_v45  ;;  %v1187_v1 = vsel %vm970_vm3, %v1114_v48, 0.0  ;;  %v992_v2 = vsel %vm970_vm3, %v1562_v38, 0.0 }
  0xf7   :  { %915 = vst.msk [vmem:[%s2438_s2 + $0x24] sm:$0xf] %vm905_vm2, %v1455_v47  ;;  %v1185_v56 = vsel %vm970_vm3, %v1113_v51, 0.0  ;;  %v1189_v14 = vsel %vm970_vm3, %v1115_v55, 0.0  ;;  %v1482_v32 = vpack.c.bf16 %v1891_v33, %v1891_v33  ;;  %v1485_v37 = vpack.c.bf16 %v1898_v39, %v1898_v39 }
  0xf8   :  { %v991_v59 = vadd.f32 %v990_v54, %v989_v53  ;;  %v1186_v60 = vadd.f32 %v1185_v56, %v1184_v52 }
  0xf9   :  { %v1565_v61 = vpop.f32.mrb[12].mxu0  ;;  %v1971_v38 = vpop.f32.mrb[12].mxu1  ;;  %942 = vst.msk [vmem:[%s2438_s2 + $0x90] sm:$0xf] %vm905_vm2, %v1482_v32  ;;  %945 = vst.msk [vmem:[%s2438_s2 + $0x9c] sm:$0xf] %vm905_vm2, %v1485_v37 }
  0xfa   :  { %v1460_v3 = vpack.c.bf16 %v1565_v61, %v1565_v61  ;;  %v442_v4 = vpop.f32.mrb[13].mxu0  ;;  %v1188_v7 = vadd.f32 %v1187_v1, %v1186_v60  ;;  %v993_v9 = vadd.f32 %v992_v2, %v991_v59  ;;  %v1118_v22 = vmul.f32 %v1565_v61, %v1565_v61  ;;  %v1979_v45 = vpop.f32.mrb[13].mxu1 }
  0xfb   :  { %v1458_v8 = vpack.c.bf16 %v442_v4, %v442_v4  ;;  %v994_v11 = vsel %vm970_vm3, %v442_v4, 0.0  ;;  %v1566_v12 = vpop.f32.mrb[14].mxu0  ;;  %v1116_v15 = vmul.f32 %v442_v4, %v442_v4  ;;  %v998_v29 = vsel %vm970_vm3, %v1565_v61, 0.0  ;;  %v1986_v51 = vpop.f32.mrb[14].mxu1 }
  0xfc   :  { %920 = vst.msk [vmem:[%s2438_s2 + $0x38] sm:$0xf] %vm905_vm2, %v1460_v3  ;;  %v1461_v16 = vpack.c.bf16 %v1566_v12, %v1566_v12  ;;  %v445_v17 = vpop.f32.mrb[15].mxu0  ;;  %v995_v19 = vadd.f32 %v994_v11, %v993_v9  ;;  %v1190_v20 = vadd.f32 %v1189_v14, %v1188_v7  ;;  %v1119_v30 = vmul.f32 %v1566_v12, %v1566_v12  ;;  %v1993_v56 = vpop.f32.mrb[15].mxu1 }
  0xfd   :  { %918 = vst.msk [vmem:[%s2438_s2 + $0x30] sm:$0xf] %vm905_vm2, %v1458_v8  ;;  %v1459_v21 = vpack.c.bf16 %v445_v17, %v445_v17  ;;  %v1191_v23 = vsel %vm970_vm3, %v1116_v15, 0.0  ;;  %v996_v24 = vsel %vm970_vm3, %v445_v17, 0.0  ;;  %v1117_v25 = vmul.f32 %v445_v17, %v445_v17 }
  0xfe   :  { %921 = vst.msk [vmem:[%s2438_s2 + $0x3c] sm:$0xf] %vm905_vm2, %v1461_v16  ;;  %v1192_v26 = vadd.f32 %v1191_v23, %v1190_v20  ;;  %v997_v27 = vadd.f32 %v996_v24, %v995_v19  ;;  %v1195_v40 = vsel %vm970_vm3, %v1118_v22, 0.0  ;;  %v1000_v41 = vsel %vm970_vm3, %v1566_v12, 0.0 }
  0xff   :  { %919 = vst.msk [vmem:[%s2438_s2 + $0x34] sm:$0xf] %vm905_vm2, %v1459_v21  ;;  %v1193_v31 = vsel %vm970_vm3, %v1117_v25, 0.0  ;;  %v1197_v52 = vsel %vm970_vm3, %v1119_v30, 0.0  ;;  %v1483_v11 = vpack.c.bf16 %v1905_v44, %v1905_v44  ;;  %v1488_v16 = vpack.c.bf16 %v1927_v63, %v1927_v63 }
 0x100   :  { %v999_v34 = vadd.f32 %v998_v29, %v997_v27  ;;  %v1194_v35 = vadd.f32 %v1193_v31, %v1192_v26 }
 0x101   :  { %v1569_v36 = vpop.f32.mrb[16].mxu0  ;;  %v2015_v17 = vpop.f32.mrb[16].mxu1  ;;  %943 = vst.msk [vmem:[%s2438_s2 + $0x94] sm:$0xf] %vm905_vm2, %v1483_v11  ;;  %948 = vst.msk [vmem:[%s2438_s2 + $0xa8] sm:$0xf] %vm905_vm2, %v1488_v16 }
 0x102   :  { %v1464_v42 = vpack.c.bf16 %v1569_v36, %v1569_v36  ;;  %v458_v43 = vpop.f32.mrb[17].mxu0  ;;  %v1196_v46 = vadd.f32 %v1195_v40, %v1194_v35  ;;  %v1001_v48 = vadd.f32 %v1000_v41, %v999_v34  ;;  %v1122_v61 = vmul.f32 %v1569_v36, %v1569_v36  ;;  %v2023_v23 = vpop.f32.mrb[17].mxu1 }
 0x103   :  { %v1462_v47 = vpack.c.bf16 %v458_v43, %v458_v43  ;;  %v1002_v49 = vsel %vm970_vm3, %v458_v43, 0.0  ;;  %v1570_v50 = vpop.f32.mrb[18].mxu0  ;;  %v1120_v53 = vmul.f32 %v458_v43, %v458_v43  ;;  %v1006_v7 = vsel %vm970_vm3, %v1569_v36, 0.0  ;;  %v2030_v30 = vpop.f32.mrb[18].mxu1 }
 0x104   :  { %924 = vst.msk [vmem:[%s2438_s2 + $0x48] sm:$0xf] %vm905_vm2, %v1464_v42  ;;  %v1465_v54 = vpack.c.bf16 %v1570_v50, %v1570_v50  ;;  %v461_v55 = vpop.f32.mrb[19].mxu0  ;;  %v1003_v57 = vadd.f32 %v1002_v49, %v1001_v48  ;;  %v1198_v59 = vadd.f32 %v1197_v52, %v1196_v46  ;;  %v1123_v8 = vmul.f32 %v1570_v50, %v1570_v50  ;;  %v2037_v36 = vpop.f32.mrb[19].mxu1 }
 0x105   :  { %922 = vst.msk [vmem:[%s2438_s2 + $0x40] sm:$0xf] %vm905_vm2, %v1462_v47  ;;  %v1463_v60 = vpack.c.bf16 %v461_v55, %v461_v55  ;;  %v1199_v62 = vsel %vm970_vm3, %v1120_v53, 0.0  ;;  %v1004_v1 = vsel %vm970_vm3, %v461_v55, 0.0  ;;  %v1121_v2 = vmul.f32 %v461_v55, %v461_v55 }
 0x106   :  { %925 = vst.msk [vmem:[%s2438_s2 + $0x4c] sm:$0xf] %vm905_vm2, %v1465_v54  ;;  %v1200_v3 = vadd.f32 %v1199_v62, %v1198_v59  ;;  %v1005_v4 = vadd.f32 %v1004_v1, %v1003_v57  ;;  %v1203_v19 = vsel %vm970_vm3, %v1122_v61, 0.0  ;;  %v1008_v20 = vsel %vm970_vm3, %v1570_v50, 0.0 }
 0x107   :  { %923 = vst.msk [vmem:[%s2438_s2 + $0x44] sm:$0xf] %vm905_vm2, %v1463_v60  ;;  %v1201_v9 = vsel %vm970_vm3, %v1121_v2, 0.0  ;;  %v1205_v31 = vsel %vm970_vm3, %v1123_v8, 0.0  ;;  %v1486_v54 = vpack.c.bf16 %v1935_v5, %v1935_v5  ;;  %v1489_v60 = vpack.c.bf16 %v1942_v13, %v1942_v13 }
 0x108   :  { %v1007_v12 = vadd.f32 %v1006_v7, %v1005_v4  ;;  %v1202_v14 = vadd.f32 %v1201_v9, %v1200_v3 }
 0x109   :  { %v1573_v15 = vpop.f32.mrb[20].mxu0  ;;  %v2059_v61 = vpop.f32.mrb[20].mxu1  ;;  %946 = vst.msk [vmem:[%s2438_s2 + $0xa0] sm:$0xf] %vm905_vm2, %v1486_v54  ;;  %949 = vst.msk [vmem:[%s2438_s2 + $0xac] sm:$0xf] %vm905_vm2, %v1489_v60 }
 0x10a   :  { %v1468_v21 = vpack.c.bf16 %v1573_v15, %v1573_v15  ;;  %v474_v22 = vpop.f32.mrb[21].mxu0  ;;  %v1204_v24 = vadd.f32 %v1203_v19, %v1202_v14  ;;  %v1009_v26 = vadd.f32 %v1008_v20, %v1007_v12  ;;  %v1126_v42 = vmul.f32 %v1573_v15, %v1573_v15  ;;  %v2067_v4 = vpop.f32.mrb[21].mxu1 }
 0x10b   :  { %v1466_v25 = vpack.c.bf16 %v474_v22, %v474_v22  ;;  %v1010_v27 = vsel %vm970_vm3, %v474_v22, 0.0  ;;  %v1574_v29 = vpop.f32.mrb[22].mxu0  ;;  %v1124_v32 = vmul.f32 %v474_v22, %v474_v22  ;;  %v1014_v50 = vsel %vm970_vm3, %v1573_v15, 0.0  ;;  %v2074_v14 = vpop.f32.mrb[22].mxu1 }
 0x10c   :  { %928 = vst.msk [vmem:[%s2438_s2 + $0x58] sm:$0xf] %vm905_vm2, %v1468_v21  ;;  %v1469_v34 = vpack.c.bf16 %v1574_v29, %v1574_v29  ;;  %v477_v35 = vpop.f32.mrb[23].mxu0  ;;  %v1011_v37 = vadd.f32 %v1010_v27, %v1009_v26  ;;  %v1206_v40 = vadd.f32 %v1205_v31, %v1204_v24  ;;  %v1127_v52 = vmul.f32 %v1574_v29, %v1574_v29  ;;  %v2081_v21 = vpop.f32.mrb[23].mxu1 }
 0x10d   :  { %926 = vst.msk [vmem:[%s2438_s2 + $0x50] sm:$0xf] %vm905_vm2, %v1466_v25  ;;  %v1467_v41 = vpack.c.bf16 %v477_v35, %v477_v35  ;;  %v1207_v43 = vsel %vm970_vm3, %v1124_v32, 0.0  ;;  %v1012_v46 = vsel %vm970_vm3, %v477_v35, 0.0  ;;  %v1125_v47 = vmul.f32 %v477_v35, %v477_v35 }
 0x10e   :  { %929 = vst.msk [vmem:[%s2438_s2 + $0x5c] sm:$0xf] %vm905_vm2, %v1469_v34  ;;  %v1208_v48 = vadd.f32 %v1207_v43, %v1206_v40  ;;  %v1013_v49 = vadd.f32 %v1012_v46, %v1011_v37  ;;  %v1211_v62 = vsel %vm970_vm3, %v1126_v42, 0.0  ;;  %v1016_v1 = vsel %vm970_vm3, %v1574_v29, 0.0 }
 0x10f   :  { %927 = vst.msk [vmem:[%s2438_s2 + $0x54] sm:$0xf] %vm905_vm2, %v1467_v41  ;;  %v1209_v53 = vsel %vm970_vm3, %v1125_v47, 0.0  ;;  %v1213_v15 = vsel %vm970_vm3, %v1127_v52, 0.0  ;;  %v1487_v41 = vpack.c.bf16 %v1949_v18, %v1949_v18  ;;  %v1492_v47 = vpack.c.bf16 %v1971_v38, %v1971_v38 }
 0x110   :  { %v1015_v55 = vadd.f32 %v1014_v50, %v1013_v49  ;;  %v1210_v57 = vadd.f32 %v1209_v53, %v1208_v48 }
 0x111   :  { %v1577_v59 = vpop.f32.mrb[24].mxu0  ;;  %v2103_v48 = vpop.f32.mrb[24].mxu1  ;;  %947 = vst.msk [vmem:[%s2438_s2 + $0xa4] sm:$0xf] %vm905_vm2, %v1487_v41  ;;  %952 = vst.msk [vmem:[%s2438_s2 + $0xb8] sm:$0xf] %vm905_vm2, %v1492_v47 }
 0x112   :  { %v1472_v2 = vpack.c.bf16 %v1577_v59, %v1577_v59  ;;  %v490_v3 = vpop.f32.mrb[25].mxu0  ;;  %v1212_v7 = vadd.f32 %v1211_v62, %v1210_v57  ;;  %v1017_v9 = vadd.f32 %v1016_v1, %v1015_v55  ;;  %v1130_v26 = vmul.f32 %v1577_v59, %v1577_v59  ;;  %v2111_v54 = vpop.f32.mrb[25].mxu1 }
 0x113   :  { %v1470_v8 = vpack.c.bf16 %v490_v3, %v490_v3  ;;  %v1018_v11 = vsel %vm970_vm3, %v490_v3, 0.0  ;;  %v1578_v12 = vpop.f32.mrb[26].mxu0  ;;  %v1128_v16 = vmul.f32 %v490_v3, %v490_v3  ;;  %v1022_v35 = vsel %vm970_vm3, %v1577_v59, 0.0  ;;  %v2118_v1 = vpop.f32.mrb[26].mxu1 }
 0x114   :  { %932 = vst.msk [vmem:[%s2438_s2 + $0x68] sm:$0xf] %vm905_vm2, %v1472_v2  ;;  %v1473_v19 = vpack.c.bf16 %v1578_v12, %v1578_v12  ;;  %v493_v20 = vpop.f32.mrb[27].mxu0  ;;  %v1019_v22 = vadd.f32 %v1018_v11, %v1017_v9  ;;  %v1214_v24 = vadd.f32 %v1213_v15, %v1212_v7  ;;  %v1131_v37 = vmul.f32 %v1578_v12, %v1578_v12  ;;  %v2125_v9 = vpop.f32.mrb[27].mxu1 }
 0x115   :  { %930 = vst.msk [vmem:[%s2438_s2 + $0x60] sm:$0xf] %vm905_vm2, %v1470_v8  ;;  %v1471_v25 = vpack.c.bf16 %v493_v20, %v493_v20  ;;  %v1215_v27 = vsel %vm970_vm3, %v1128_v16, 0.0  ;;  %v1020_v29 = vsel %vm970_vm3, %v493_v20, 0.0  ;;  %v1129_v31 = vmul.f32 %v493_v20, %v493_v20 }
 0x116   :  { %933 = vst.msk [vmem:[%s2438_s2 + $0x6c] sm:$0xf] %vm905_vm2, %v1473_v19  ;;  %v1216_v32 = vadd.f32 %v1215_v27, %v1214_v24  ;;  %v1021_v34 = vadd.f32 %v1020_v29, %v1019_v22  ;;  %v1219_v49 = vsel %vm970_vm3, %v1130_v26, 0.0  ;;  %v1024_v50 = vsel %vm970_vm3, %v1578_v12, 0.0 }
 0x117   :  { %931 = vst.msk [vmem:[%s2438_s2 + $0x64] sm:$0xf] %vm905_vm2, %v1471_v25  ;;  %v1217_v40 = vsel %vm970_vm3, %v1129_v31, 0.0  ;;  %v1221_v2 = vsel %vm970_vm3, %v1131_v37, 0.0  ;;  %v1136_v26 = vmul.f32 %v1846_v0, %v1846_v0  ;;  %v1493_v37 = vpack.c.bf16 %v1986_v51, %v1986_v51 }
 0x118   :  { %v1023_v42 = vadd.f32 %v1022_v35, %v1021_v34  ;;  %v1218_v43 = vadd.f32 %v1217_v40, %v1216_v32  ;;  %v1490_v32 = vpack.c.bf16 %v1979_v45, %v1979_v45 }
 0x119   :  { %v1581_v46 = vpop.f32.mrb[28].mxu0  ;;  %v2149_v40 = vpop.f32.mrb[28].mxu1  ;;  %953 = vst.msk [vmem:[%s2438_s2 + $0xbc] sm:$0xf] %vm905_vm2, %v1493_v37 }
 0x11a   :  { %v1476_v52 = vpack.c.bf16 %v1581_v46, %v1581_v46  ;;  %v506_v53 = vpop.f32.mrb[29].mxu0  ;;  %v1220_v55 = vadd.f32 %v1219_v49, %v1218_v43  ;;  %v1025_v59 = vadd.f32 %v1024_v50, %v1023_v42  ;;  %v1134_v16 = vmul.f32 %v1581_v46, %v1581_v46  ;;  %950 = vst.msk [vmem:[%s2438_s2 + $0xb0] sm:$0xf] %vm905_vm2, %v1490_v32  ;;  %v2161_v47 = vpop.f32.mrb[29].mxu1 }
 0x11b   :  { %v1474_v57 = vpack.c.bf16 %v506_v53, %v506_v53  ;;  %v1026_v60 = vsel %vm970_vm3, %v506_v53, 0.0  ;;  %v1582_v62 = vpop.f32.mrb[30].mxu0  ;;  %v1132_v3 = vmul.f32 %v506_v53, %v506_v53  ;;  %v1030_v27 = vsel %vm970_vm3, %v1581_v46, 0.0 }
 0x11c   :  { %936 = vst.msk [vmem:[%s2438_s2 + $0x78] sm:$0xf] %vm905_vm2, %v1476_v52  ;;  %v1477_v7 = vpack.c.bf16 %v1582_v62, %v1582_v62  ;;  %v509_v8 = vpop.f32.mrb[31].mxu0  ;;  %v1027_v11 = vadd.f32 %v1026_v60, %v1025_v59  ;;  %v1222_v12 = vadd.f32 %v1221_v2, %v1220_v55  ;;  %v1135_v29 = vmul.f32 %v1582_v62, %v1582_v62  ;;  %v2167_v52 = vpop.f32.mrb[30].mxu1 }
 0x11d   :  { %934 = vst.msk [vmem:[%s2438_s2 + $0x70] sm:$0xf] %vm905_vm2, %v1474_v57  ;;  %v1475_v15 = vpack.c.bf16 %v509_v8, %v509_v8  ;;  %v1223_v19 = vsel %vm970_vm3, %v1132_v3, 0.0  ;;  %v1028_v20 = vsel %vm970_vm3, %v509_v8, 0.0  ;;  %v1133_v22 = vmul.f32 %v509_v8, %v509_v8  ;;  %v2179_v59 = vpop.f32.mrb[31].mxu1 }
 0x11e   :  { %937 = vst.msk [vmem:[%s2438_s2 + $0x7c] sm:$0xf] %vm905_vm2, %v1477_v7  ;;  %v1224_v24 = vadd.f32 %v1223_v19, %v1222_v12  ;;  %v1029_v25 = vadd.f32 %v1028_v20, %v1027_v11  ;;  %v1227_v41 = vsel %vm970_vm3, %v1134_v16, 0.0  ;;  %v1032_v42 = vsel %vm970_vm3, %v1582_v62, 0.0 }
 0x11f   :  { %935 = vst.msk [vmem:[%s2438_s2 + $0x74] sm:$0xf] %vm905_vm2, %v1475_v15  ;;  %v1225_v31 = vsel %vm970_vm3, %v1133_v22, 0.0  ;;  %v1034_v43 = vsel %vm970_vm3, %v1846_v0, 0.0  ;;  %v1491_v46 = vpack.c.bf16 %v1993_v56, %v1993_v56  ;;  %v1229_v0 = vsel %vm970_vm3, %v1135_v29, 0.0 }
 0x120   :  { %v1031_v34 = vadd.f32 %v1030_v27, %v1029_v25  ;;  %v1226_v35 = vadd.f32 %v1225_v31, %v1224_v24  ;;  %v1231_v53 = vsel %vm970_vm3, %v1136_v26, 0.0  ;;  %v1137_v55 = vmul.f32 %v1855_v10, %v1855_v10 }
 0x121   :  { %951 = vst.msk [vmem:[%s2438_s2 + $0xb4] sm:$0xf] %vm905_vm2, %v1491_v46  ;;  %v1496_v57 = vpack.c.bf16 %v2015_v17, %v2015_v17  ;;  %v1494_v2 = vpack.c.bf16 %v2023_v23, %v2023_v23  ;;  %v1138_v3 = vmul.f32 %v1842_v58, %v1842_v58  ;;  %v1036_v7 = vsel %vm970_vm3, %v1855_v10, 0.0 }
 0x122   :  { %v1228_v49 = vadd.f32 %v1227_v41, %v1226_v35  ;;  %v1033_v50 = vadd.f32 %v1032_v42, %v1031_v34  ;;  %v1497_v8 = vpack.c.bf16 %v2030_v30, %v2030_v30  ;;  %v1038_v11 = vsel %vm970_vm3, %v1842_v58, 0.0 }
 0x123   :  { %956 = vst.msk [vmem:[%s2438_s2 + $0xc8] sm:$0xf] %vm905_vm2, %v1496_v57  ;;  %954 = vst.msk [vmem:[%s2438_s2 + $0xc0] sm:$0xf] %vm905_vm2, %v1494_v2  ;;  %v1139_v10 = vmul.f32 %v1849_v6, %v1849_v6  ;;  %v1233_v16 = vsel %vm970_vm3, %v1137_v55, 0.0  ;;  %v1140_v19 = vmul.f32 %v1891_v33, %v1891_v33  ;;  %v1495_v58 = vpack.c.bf16 %v2037_v36, %v2037_v36 }
 0x124   :  { %v1035_v60 = vadd.f32 %v1034_v43, %v1033_v50  ;;  %v1230_v62 = vadd.f32 %v1229_v0, %v1228_v49  ;;  %957 = vst.msk [vmem:[%s2438_s2 + $0xcc] sm:$0xf] %vm905_vm2, %v1497_v8  ;;  %v1500_v24 = vpack.c.bf16 %v2059_v61, %v2059_v61  ;;  %v1235_v25 = vsel %vm970_vm3, %v1138_v3, 0.0 }
 0x125   :  { %v1040_v26 = vsel %vm970_vm3, %v1849_v6, 0.0  ;;  %v1042_v27 = vsel %vm970_vm3, %v1891_v33, 0.0  ;;  %955 = vst.msk [vmem:[%s2438_s2 + $0xc4] sm:$0xf] %vm905_vm2, %v1495_v58  ;;  %v1498_v29 = vpack.c.bf16 %v2067_v4, %v2067_v4  ;;  %v1237_v6 = vsel %vm970_vm3, %v1139_v10, 0.0 }
 0x126   :  { %v1232_v12 = vadd.f32 %v1231_v53, %v1230_v62  ;;  %v1037_v15 = vadd.f32 %v1036_v7, %v1035_v60  ;;  %960 = vst.msk [vmem:[%s2438_s2 + $0xd8] sm:$0xf] %vm905_vm2, %v1500_v24  ;;  %v1239_v34 = vsel %vm970_vm3, %v1140_v19, 0.0  ;;  %v1141_v33 = vmul.f32 %v1905_v44, %v1905_v44 }
 0x127   :  { %958 = vst.msk [vmem:[%s2438_s2 + $0xd0] sm:$0xf] %vm905_vm2, %v1498_v29  ;;  %v1501_v35 = vpack.c.bf16 %v2074_v14, %v2074_v14  ;;  %v1499_v42 = vpack.c.bf16 %v2081_v21, %v2081_v21  ;;  %v1142_v43 = vmul.f32 %v1883_v28, %v1883_v28  ;;  %v1044_v46 = vsel %vm970_vm3, %v1905_v44, 0.0 }
 0x128   :  { %v1039_v20 = vadd.f32 %v1038_v11, %v1037_v15  ;;  %v1234_v22 = vadd.f32 %v1233_v16, %v1232_v12  ;;  %v1504_v49 = vpack.c.bf16 %v2103_v48, %v2103_v48  ;;  %v1046_v50 = vsel %vm970_vm3, %v1883_v28, 0.0 }
 0x129   :  { %961 = vst.msk [vmem:[%s2438_s2 + $0xdc] sm:$0xf] %vm905_vm2, %v1501_v35  ;;  %959 = vst.msk [vmem:[%s2438_s2 + $0xd4] sm:$0xf] %vm905_vm2, %v1499_v42  ;;  %v1143_v44 = vmul.f32 %v1898_v39, %v1898_v39  ;;  %v1241_v55 = vsel %vm970_vm3, %v1141_v33, 0.0  ;;  %v1144_v57 = vmul.f32 %v1935_v5, %v1935_v5  ;;  %v1502_v28 = vpack.c.bf16 %v2111_v54, %v2111_v54 }
 0x12a   :  { %v1236_v31 = vadd.f32 %v1235_v25, %v1234_v22  ;;  %v1041_v32 = vadd.f32 %v1040_v26, %v1039_v20  ;;  %964 = vst.msk [vmem:[%s2438_s2 + $0xe8] sm:$0xf] %vm905_vm2, %v1504_v49  ;;  %v1505_v2 = vpack.c.bf16 %v2118_v1, %v2118_v1  ;;  %v1243_v3 = vsel %vm970_vm3, %v1142_v43, 0.0 }
 0x12b   :  { %v1048_v7 = vsel %vm970_vm3, %v1898_v39, 0.0  ;;  %v1050_v8 = vsel %vm970_vm3, %v1935_v5, 0.0  ;;  %962 = vst.msk [vmem:[%s2438_s2 + $0xe0] sm:$0xf] %vm905_vm2, %v1502_v28  ;;  %v1503_v11 = vpack.c.bf16 %v2125_v9, %v2125_v9  ;;  %v1245_v39 = vsel %vm970_vm3, %v1143_v44, 0.0 }
 0x12c   :  { %v1043_v37 = vadd.f32 %v1042_v27, %v1041_v32  ;;  %v1238_v41 = vadd.f32 %v1237_v6, %v1236_v31  ;;  %965 = vst.msk [vmem:[%s2438_s2 + $0xec] sm:$0xf] %vm905_vm2, %v1505_v2  ;;  %v1247_v10 = vsel %vm970_vm3, %v1144_v57, 0.0  ;;  %v1145_v5 = vmul.f32 %v1949_v18, %v1949_v18 }
 0x12d   :  { %963 = vst.msk [vmem:[%s2438_s2 + $0xe4] sm:$0xf] %vm905_vm2, %v1503_v11  ;;  %v1508_v16 = vpack.c.bf16 %v2149_v40, %v2149_v40  ;;  %v1506_v20 = vpack.c.bf16 %v2161_v47, %v2161_v47  ;;  %v1146_v22 = vmul.f32 %v1927_v63, %v1927_v63  ;;  %v1052_v24 = vsel %vm970_vm3, %v1949_v18, 0.0 }
 0x12e   :  { %v1240_v0 = vadd.f32 %v1239_v34, %v1238_v41  ;;  %v1045_v53 = vadd.f32 %v1044_v46, %v1043_v37  ;;  %v1509_v25 = vpack.c.bf16 %v2167_v52, %v2167_v52  ;;  %v1054_v26 = vsel %vm970_vm3, %v1927_v63, 0.0 }
 0x12f   :  { %968 = vst.msk [vmem:[%s2438_s2 + $0xf8] sm:$0xf] %vm905_vm2, %v1508_v16  ;;  %966 = vst.msk [vmem:[%s2438_s2 + $0xf0] sm:$0xf] %vm905_vm2, %v1506_v20  ;;  %v1147_v18 = vmul.f32 %v1942_v13, %v1942_v13  ;;  %v1249_v31 = vsel %vm970_vm3, %v1145_v5, 0.0  ;;  %v1148_v32 = vmul.f32 %v1979_v45, %v1979_v45  ;;  %v1507_v63 = vpack.c.bf16 %v2179_v59, %v2179_v59 }
 0x130   :  { %v1047_v60 = vadd.f32 %v1046_v50, %v1045_v53  ;;  %v1242_v62 = vadd.f32 %v1241_v55, %v1240_v0  ;;  %969 = vst.msk [vmem:[%s2438_s2 + $0xfc] sm:$0xf] %vm905_vm2, %v1509_v25  ;;  %v1251_v33 = vsel %vm970_vm3, %v1146_v22, 0.0  ;;  %v1056_v35 = vsel %vm970_vm3, %v1942_v13, 0.0 }
 0x131   :  { %v1058_v37 = vsel %vm970_vm3, %v1979_v45, 0.0  ;;  %967 = vst.msk [vmem:[%s2438_s2 + $0xf4] sm:$0xf] %vm905_vm2, %v1507_v63  ;;  %v1253_v43 = vsel %vm970_vm3, %v1147_v18, 0.0  ;;  %v1255_v46 = vsel %vm970_vm3, %v1148_v32, 0.0  ;;  %v1149_v49 = vmul.f32 %v1993_v56, %v1993_v56 }
 0x132   :  { %v1244_v12 = vadd.f32 %v1243_v3, %v1242_v62  ;;  %v1049_v15 = vadd.f32 %v1048_v7, %v1047_v60  ;;  %v1150_v13 = vmul.f32 %v1971_v38, %v1971_v38  ;;  %v1060_v45 = vsel %vm970_vm3, %v1993_v56, 0.0 }
 0x133   :  { %v1062_v55 = vsel %vm970_vm3, %v1971_v38, 0.0  ;;  %v1151_v57 = vmul.f32 %v1986_v51, %v1986_v51  ;;  %v1257_v28 = vsel %vm970_vm3, %v1149_v49, 0.0  ;;  %v1152_v60 = vmul.f32 %v2023_v23, %v2023_v23 }
 0x134   :  { %v1051_v19 = vadd.f32 %v1050_v8, %v1049_v15  ;;  %v1246_v58 = vadd.f32 %v1245_v39, %v1244_v12  ;;  %v1259_v3 = vsel %vm970_vm3, %v1150_v13, 0.0  ;;  %v1064_v56 = vsel %vm970_vm3, %v1986_v51, 0.0 }
 0x135   :  { %v1066_v7 = vsel %vm970_vm3, %v2023_v23, 0.0  ;;  %v1261_v11 = vsel %vm970_vm3, %v1151_v57, 0.0  ;;  %v1263_v12 = vsel %vm970_vm3, %v1152_v60, 0.0  ;;  %v1153_v15 = vmul.f32 %v2037_v36, %v2037_v36 }
 0x136   :  { %v1248_v27 = vadd.f32 %v1247_v10, %v1246_v58  ;;  %v1053_v29 = vadd.f32 %v1052_v24, %v1051_v19  ;;  %v1154_v5 = vmul.f32 %v2015_v17, %v2015_v17  ;;  %v1068_v51 = vsel %vm970_vm3, %v2037_v36, 0.0 }
 0x137   :  { %v1070_v23 = vsel %vm970_vm3, %v2015_v17, 0.0  ;;  %v1155_v58 = vmul.f32 %v2030_v30, %v2030_v30  ;;  %v1265_v20 = vsel %vm970_vm3, %v1153_v15, 0.0  ;;  %v1156_v22 = vmul.f32 %v2067_v4, %v2067_v4 }
 0x138   :  { %v1055_v6 = vadd.f32 %v1054_v26, %v1053_v29  ;;  %v1250_v34 = vadd.f32 %v1249_v31, %v1248_v27  ;;  %v1267_v26 = vsel %vm970_vm3, %v1154_v5, 0.0  ;;  %v1072_v36 = vsel %vm970_vm3, %v2030_v30, 0.0 }
 0x139   :  { %v1074_v27 = vsel %vm970_vm3, %v2067_v4, 0.0  ;;  %v1269_v18 = vsel %vm970_vm3, %v1155_v58, 0.0  ;;  %v1271_v31 = vsel %vm970_vm3, %v1156_v22, 0.0  ;;  %v1157_v32 = vmul.f32 %v2081_v21, %v2081_v21 }
 0x13a   :  { %v1252_v41 = vadd.f32 %v1251_v33, %v1250_v34  ;;  %v1057_v42 = vadd.f32 %v1056_v35, %v1055_v6  ;;  %v1158_v34 = vmul.f32 %v2059_v61, %v2059_v61  ;;  %v1076_v30 = vsel %vm970_vm3, %v2081_v21, 0.0 }
 0x13b   :  { %v1078_v4 = vsel %vm970_vm3, %v2059_v61, 0.0  ;;  %v1080_v21 = vsel %vm970_vm3, %v2074_v14, 0.0  ;;  %v1162_v57 = vmul.f32 %v2103_v48, %v2103_v48 }
 0x13c   :  { %v1059_v50 = vadd.f32 %v1058_v37, %v1057_v42  ;;  %v1254_v0 = vadd.f32 %v1253_v43, %v1252_v41  ;;  %v1159_v37 = vmul.f32 %v2074_v14, %v2074_v14  ;;  %v1273_v41 = vsel %vm970_vm3, %v1157_v32, 0.0 }
 0x13d   :  { %v1160_v42 = vmul.f32 %v2111_v54, %v2111_v54  ;;  %v1275_v49 = vsel %vm970_vm3, %v1158_v34, 0.0  ;;  %v1084_v14 = vsel %vm970_vm3, %v2125_v9, 0.0 }
 0x13e   :  { %v1256_v53 = vadd.f32 %v1255_v46, %v1254_v0  ;;  %v1061_v44 = vadd.f32 %v1060_v45, %v1059_v50  ;;  %v1082_v50 = vsel %vm970_vm3, %v2111_v54, 0.0  ;;  %v1277_v13 = vsel %vm970_vm3, %v1159_v37, 0.0 }
 0x13f   :  { %v1279_v45 = vsel %vm970_vm3, %v1160_v42, 0.0  ;;  %v1086_v54 = vsel %vm970_vm3, %v2103_v48, 0.0 }
 0x140   :  { %v1063_v62 = vadd.f32 %v1062_v55, %v1061_v44  ;;  %v1258_v2 = vadd.f32 %v1257_v28, %v1256_v53  ;;  %v1161_v53 = vmul.f32 %v2125_v9, %v2125_v9  ;;  %v1088_v9 = vsel %vm970_vm3, %v2118_v1, 0.0 }
 0x142   :  { %v1260_v8 = vadd.f32 %v1259_v3, %v1258_v2  ;;  %v1065_v38 = vadd.f32 %v1064_v56, %v1063_v62  ;;  %v1163_v62 = vmul.f32 %v2118_v1, %v2118_v1  ;;  %v1281_v2 = vsel %vm970_vm3, %v1161_v53, 0.0 }
 0x143   :  { %v1164_v3 = vmul.f32 %v2161_v47, %v2161_v47  ;;  %v1092_v1 = vsel %vm970_vm3, %v2179_v59, 0.0 }
 0x144   :  { %v1067_v39 = vadd.f32 %v1066_v7, %v1065_v38  ;;  %v1262_v10 = vadd.f32 %v1261_v11, %v1260_v8  ;;  %v1283_v8 = vsel %vm970_vm3, %v1162_v57, 0.0  ;;  %v1090_v38 = vsel %vm970_vm3, %v2161_v47, 0.0 }
 0x145   :  { %v1287_v15 = vsel %vm970_vm3, %v1164_v3, 0.0  ;;  %v1094_v47 = vsel %vm970_vm3, %v2149_v40, 0.0 }
 0x146   :  { %v1264_v16 = vadd.f32 %v1263_v12, %v1262_v10  ;;  %v1069_v19 = vadd.f32 %v1068_v51, %v1067_v39  ;;  %v1285_v12 = vsel %vm970_vm3, %v1163_v62, 0.0  ;;  %v1165_v39 = vmul.f32 %v2179_v59, %v2179_v59 }
 0x147   :  { %v1166_v51 = vmul.f32 %v2149_v40, %v2149_v40 }
 0x148   :  { %v1071_v24 = vadd.f32 %v1070_v23, %v1069_v19  ;;  %v1266_v25 = vadd.f32 %v1265_v20, %v1264_v16  ;;  %v1167_v23 = vmul.f32 %v2167_v52, %v2167_v52  ;;  %v1289_v58 = vsel %vm970_vm3, %v1165_v39, 0.0 }
 0x14a   :  { %v1268_v29 = vadd.f32 %v1267_v26, %v1266_v25  ;;  %v1073_v17 = vadd.f32 %v1072_v36, %v1071_v24  ;;  %v1291_v24 = vsel %vm970_vm3, %v1166_v51, 0.0  ;;  %v1096_v25 = vsel %vm970_vm3, %v2167_v52, 0.0 }
 0x14b   :  { %v1293_v59 = vsel %vm970_vm3, %v1167_v23, 0.0 }
 0x14c   :  { %v1075_v63 = vadd.f32 %v1074_v27, %v1073_v17  ;;  %v1270_v6 = vadd.f32 %v1269_v18, %v1268_v29 }
 0x14e   :  { %v1272_v33 = vadd.f32 %v1271_v31, %v1270_v6  ;;  %v1077_v35 = vadd.f32 %v1076_v30, %v1075_v63 }
 0x150   :  { %v1079_v43 = vadd.f32 %v1078_v4, %v1077_v35  ;;  %v1274_v46 = vadd.f32 %v1273_v41, %v1272_v33 }
 0x152   :  { %v1276_v0 = vadd.f32 %v1275_v49, %v1274_v46  ;;  %v1081_v61 = vadd.f32 %v1080_v21, %v1079_v43 }
 0x154   :  { %v1083_v44 = vadd.f32 %v1082_v50, %v1081_v61  ;;  %v1278_v55 = vadd.f32 %v1277_v13, %v1276_v0 }
 0x156   :  { %v1280_v28 = vadd.f32 %v1279_v45, %v1278_v55  ;;  %v1085_v60 = vadd.f32 %v1084_v14, %v1083_v44 }
 0x158   :  { %v1087_v56 = vadd.f32 %v1086_v54, %v1085_v60  ;;  %v1282_v7 = vadd.f32 %v1281_v2, %v1280_v28 }
 0x15a   :  { %v1284_v11 = vadd.f32 %v1283_v8, %v1282_v7  ;;  %v1089_v48 = vadd.f32 %v1088_v9, %v1087_v56 }
 0x15c   :  { %v1091_v10 = vadd.f32 %v1090_v38, %v1089_v48  ;;  %v1286_v5 = vadd.f32 %v1285_v12, %v1284_v11 }
 0x15e   :  { %v1288_v16 = vadd.f32 %v1287_v15, %v1286_v5  ;;  %v1093_v19 = vadd.f32 %v1092_v1, %v1091_v10 }
 0x160   :  { %v1095_v20 = vadd.f32 %v1094_v47, %v1093_v19  ;;  %v1290_v22 = vadd.f32 %v1289_v58, %v1288_v16 }
 0x162   :  { %v1097_v26 = vadd.f32 %v1096_v25, %v1095_v20  ;;  %v1292_v36 = vadd.f32 %v1291_v24, %v1290_v22 }
 0x164   :  { %v1098_v27 = vrot.slane %v1097_v26, 4  ;;  %v1294_v29 = vadd.f32 %v1293_v59, %v1292_v36 }
 0x166   :  { %v1099_v17 = vadd.f32 %v1098_v27, %v1097_v26  ;;  %v1295_v40 = vrot.slane %v1294_v29, 4 }
 0x168   :  { %v1100_v18 = vrot.slane %v1099_v17, 2  ;;  %v1296_v31 = vadd.f32 %v1295_v40, %v1294_v29 }
 0x16a   :  { %v1101_v32 = vadd.f32 %v1100_v18, %v1099_v17  ;;  %v1297_v63 = vrot.slane %v1296_v31, 2 }
 0x16c   :  { %v1102_v6 = vrot.slane %v1101_v32, 1  ;;  %v1298_v34 = vadd.f32 %v1297_v63, %v1296_v31 }
 0x16e   :  { %v1103_v30 = vadd.f32 %v1102_v6, %v1101_v32  ;;  %v1299_v33 = vrot.slane %v1298_v34, 1 }
 0x170   :  { %v1300_v35 = vadd.f32 %v1299_v33, %v1298_v34  ;;  %1301 = vst.msk [vmem:[%s2439_s3] sm:$0xff] %vm970_vm3, %v1103_v30 }
 0x172   :  { %1302 = vst.msk [vmem:[%s2440_s4] sm:$0xff] %vm970_vm3, %v1300_v35 }

</bundles_post_ra>
